<compile_context>
chip_gen: v6e
topology: v6e:2x2x1
jax: 0.10.0
libtpu: 0.0.40
codegen_flags: <defaults>
</compile_context>

<pallas_src>
import jax
import jax.numpy as jnp
from jax.experimental import pallas as pl
from jax.experimental.pallas import tpu as pltpu


def _swish_kernel(x_ref, o_ref):
    # Memory-bound elementwise op: compute in f32 (free under the HBM
    # roofline, more accurate for bf16 inputs).  sigmoid via tanh -> a single
    # EUP op per element; multiply/add stay on the VPU.
    x = x_ref[...].astype(jnp.float32)
    y = 0.5 * x * (1.0 + jnp.tanh(0.5 * x))  # == x * sigmoid(x)
    o_ref[...] = y.astype(o_ref.dtype)


_LANE_CANDIDATES = (4096, 2048, 1024, 512, 256, 128)


def _swish_2d(x2d: jnp.ndarray, *, target_block_bytes: int) -> jnp.ndarray:
    """Run the Swish kernel over a (rows, lanes) slab; lanes % 128 == 0."""
    rows, lanes = x2d.shape
    dtype = x2d.dtype
    itemsize = jnp.dtype(dtype).itemsize
    row_align = 8 * max(1, 4 // itemsize)  # sublane tile: 8 f32, 16 bf16, 32 int8

    # Biggest block that (a) stays near the byte target and (b) still leaves
    # >=4 grid steps so double-buffering overlaps DMA with compute and both
    # v7x TensorCores get work.  Never below one sublane tile; never above the
    # array extent (full-extent blocks are always legal).
    tr = target_block_bytes // (lanes * itemsize)
    tr = min(tr, pl.cdiv(rows, 4))
    tr = max(row_align, (tr // row_align) * row_align)
    tr = min(tr, rows)
    grid = (pl.cdiv(rows, tr),)  # ragged last block: Pallas masks OOB stores

    block_bytes = tr * lanes * itemsize
    # in + out, double-buffered, plus headroom for Mosaic internal scratch;
    # capped below v7x's 64 MiB physical VMEM (v5e/v6e have 128 MiB).
    vmem_limit = min(4 * block_bytes + 16 * 1024 * 1024, 48 * 1024 * 1024)

    return pl.pallas_call(
        _swish_kernel,
        out_shape=jax.ShapeDtypeStruct((rows, lanes), dtype),
        grid_spec=pltpu.PrefetchScalarGridSpec(
            num_scalar_prefetch=0,
            grid=grid,
            in_specs=[pl.BlockSpec((tr, lanes), lambda i: (i, 0))],
            out_specs=pl.BlockSpec((tr, lanes), lambda i: (i, 0)),
        ),
        compiler_params=pltpu.CompilerParams(
            dimension_semantics=("parallel",),
            vmem_limit_bytes=vmem_limit,
        ),
    )(x2d)


def swish(x: jnp.ndarray, *, target_block_bytes: int = 8 * 1024 * 1024) -> jnp.ndarray:
    """Elementwise Swish over an arbitrary-shaped array (NCHW or anything else)."""
    orig_shape = x.shape
    dtype = x.dtype
    total = x.size
    if total == 0:
        return x

    flat = x.reshape(-1)

    # Fast path: widest lane-dense slab width that exactly divides the flat
    # size -> the whole array streams through the kernel with zero
    # wrapper-side copies (the reshape is layout-free).
    for cand in _LANE_CANDIDATES:
        if total % cand == 0:
            out2d = _swish_2d(
                flat.reshape(total // cand, cand),
                target_block_bytes=target_block_bytes,
            )
            return out2d.reshape(orig_shape)

    # Ragged fallback: run the kernel on the widest lane-aligned prefix and
    # handle the < lanes-element tail with one trivial XLA op.  This avoids
    # the old jnp.pad + trailing-slice pair (each a full-array HBM round trip).
    lanes = next((c for c in _LANE_CANDIDATES if total >= c), None)
    if lanes is None:
        # Fewer than 128 elements: not worth a kernel launch.
        xf = flat.astype(jnp.float32)
        return (xf * jax.nn.sigmoid(xf)).astype(dtype).reshape(orig_shape)

    main = (total // lanes) * lanes
    main_out = _swish_2d(
        flat[:main].reshape(main // lanes, lanes),
        target_block_bytes=target_block_bytes,
    ).reshape(-1)
    tail_f = flat[main:].astype(jnp.float32)
    tail_out = (tail_f * jax.nn.sigmoid(tail_f)).astype(dtype)
    return jnp.concatenate([main_out, tail_out]).reshape(orig_shape)


if __name__ == "__main__":
    key = jax.random.PRNGKey(0)
    k0, k1, k2 = jax.random.split(key, 3)

    # 1) Small NCHW feature map consistent with the conv-LSTM module
    #    (fast path: 2048 elements -> single full-extent (1, 2048) block).
    x = jax.random.normal(k0, (2, 4, 16, 16), dtype=jnp.float32)
    y = jax.block_until_ready(swish(x))
    y_ref = x * jax.nn.sigmoid(x)
    assert y.shape == x.shape and y.dtype == x.dtype
    assert jnp.max(jnp.abs(y - y_ref)) < 1e-5

    # 2) Larger f32 input exercising the multi-block path:
    #    lanes=4096, rows=192, grid=(4,) -> pipelined, megacore-friendly.
    x_big = jax.random.normal(k1, (4, 16, 96, 128), dtype=jnp.float32)
    y_big = jax.block_until_ready(swish(x_big))
    y_big_ref = x_big * jax.nn.sigmoid(x_big)
    assert jnp.max(jnp.abs(y_big - y_big_ref)) < 1e-5

    # 3) Ragged bf16 input exercising the prefix-kernel + XLA-tail fallback
    #    and the f32 internal compute path.
    x_bf = jax.random.normal(k2, (3, 5, 77), dtype=jnp.bfloat16)
    y_bf = jax.block_until_ready(swish(x_bf))
    xf = x_bf.astype(jnp.float32)
    y_bf_ref = (xf * jax.nn.sigmoid(xf)).astype(jnp.bfloat16)
    assert y_bf.shape == x_bf.shape and y_bf.dtype == x_bf.dtype
    assert jnp.max(jnp.abs(y_bf.astype(jnp.float32) - y_bf_ref.astype(jnp.float32))) < 5e-2

    print("KERNEL_OK")
</pallas_src>

<mosaic_0001>
module attributes {stable_mosaic.version = 11 : i64} {
  func.func @_swish_kernel(%arg0: i32, %arg1: memref<1x2048xf32, #tpu.memory_space<vmem>>, %arg2: memref<1x2048xf32, #tpu.memory_space<vmem>>) attributes {dimension_semantics = [#tpu.dimension_semantics<parallel>], iteration_bounds = array<i64: 1>, scalar_prefetch = 0 : i64, scratch_operands = 0 : i64, tpu.core_type = #tpu.core_type<tc>, window_params = [{transform_indices = @transform_0, window_bounds = array<i64: 1, 2048>}, {transform_indices = @transform_1, window_bounds = array<i64: 1, 2048>}]} {
    %c0 = arith.constant 0 : index
    %c0_0 = arith.constant 0 : index
    %0 = vector.load %arg1[%c0, %c0_0] : memref<1x2048xf32, #tpu.memory_space<vmem>>, vector<1x2048xf32>
    %cst = arith.constant 5.000000e-01 : f32
    %1 = vector.broadcast %cst : f32 to vector<1x2048xf32>
    %2 = arith.mulf %1, %0 : vector<1x2048xf32>
    %cst_1 = arith.constant 5.000000e-01 : f32
    %3 = vector.broadcast %cst_1 : f32 to vector<1x2048xf32>
    %4 = arith.mulf %3, %0 : vector<1x2048xf32>
    %5 = math.tanh %4 : vector<1x2048xf32>
    %cst_2 = arith.constant 1.000000e+00 : f32
    %6 = vector.broadcast %cst_2 : f32 to vector<1x2048xf32>
    %7 = arith.addf %6, %5 : vector<1x2048xf32>
    %8 = arith.mulf %2, %7 : vector<1x2048xf32>
    %c0_3 = arith.constant 0 : index
    %c0_4 = arith.constant 0 : index
    %9 = vector.load %arg2[%c0_3, %c0_4] : memref<1x2048xf32, #tpu.memory_space<vmem>>, vector<1x2048xf32>
    tpu.vector_store %arg2[%c0_3, %c0_4], %8 {strides = array<i32>} : memref<1x2048xf32, #tpu.memory_space<vmem>>, vector<1x2048xf32>,
    return
  }
  func.func @transform_0(%arg0: i32) -> (i32, i32) {
    %c0_i32 = arith.constant 0 : i32
    %c0_i32_0 = arith.constant 0 : i32
    return %arg0, %c0_i32 : i32, i32
  }
  func.func @transform_1(%arg0: i32) -> (i32, i32) {
    %c0_i32 = arith.constant 0 : i32
    %c0_i32_0 = arith.constant 0 : i32
    return %arg0, %c0_i32 : i32, i32
  }
}

</mosaic_0001>

<bundles_post_ra>
// kernel: tpu_custom_call.1
= control target key start
LH: loop header
LB: loop body
LE: loop exit
PB: predicated region body
PF: predicated region fallthrough
CT: control target
= control target key end

     0   :  { %6 = vsyncpa [#allocation3], 0  ;;  %s116_s0 = inlined_call_operand.hbm [shape: f32[1,2048], index: 0, kind: input, shape index: {}]   ;;  %s117_s1 = inlined_call_operand.hbm [shape: f32[1,2048], index: 1, kind: output, shape index: {}]  }
   0x1   :  { %7 = vsyncpa [#allocation4], 0  ;;  %s98_s6 = smov [#allocation2]  }
   0x2   :  { %s14_s7 = sshll.u32 %s98_s6, 4  ;;  %s15_s7 = int_to_ptr.vmem [resolvable:$true] %s14_s7 }
   0x3   :  { %s62_s8 = scalar_lea.vmem %s15_s7, 256  ;;  %p67_p1 = scmp.lt.s32.totalorder %s15_s7, %s15_s7 }
   0x4   :  { %p63_p0 = scmp.ne.s32.totalorder %s15_s7, %s62_s8  ;;  %p68_p2 = scmp.lt.s32.totalorder %s62_s8, %s62_s8 }
   0x6   :  { %p69_p3 = por %p68_p2, %p67_p1 }
   0x8   :  { %p70_p4 = pnand %p69_p3, %p63_p0 }
   0xa   :  { %73 = shalt.err (!%p70_p4)
}
   0xb   :  { %17 = dma.hbm_to_vmem [thread:$0]  %s116_s0, 256, %s15_s7, [#allocation3]  }
   0xc   :  { %94 = dma.done.wait [#allocation3], 256  }
   0xd   :  { %95 = vsyncadd [#allocation3], 4294967040  ;;  %v21_v0 = vld [vmem:[#allocation2] sm:$0xff]  ;;  %v22_v1 = vld [vmem:[#allocation2 + $0x8] sm:$0xff]  ;;  %s99_s11 = smov [#allocation5]  }
   0xe   :  { %v23_v2 = vmul.f32 0.5, %v21_v0  ;;  %v24_v3 = vmul.f32 0.5, %v22_v1  ;;  %s39_s12 = sshll.u32 %s99_s11, 4  ;;  %s40_s12 = int_to_ptr.vmem [resolvable:$true] %s39_s12 }
   0xf   :  { %s74_s0 = scalar_lea.vmem %s40_s12, 256  ;;  %p79_p6 = scmp.lt.s32.totalorder %s40_s12, %s40_s12 }
  0x10   :  { %50 = vtanh.f32 %v23_v2  ;;  %p75_p5 = scmp.ne.s32.totalorder %s40_s12, %s74_s0  ;;  %p80_p7 = scmp.lt.s32.totalorder %s74_s0, %s74_s0 }
  0x11   :  { %52 = vtanh.f32 %v24_v3 }
  0x12   :  { %p81_p8 = por %p80_p7, %p79_p6 }
  0x14   :  { %p82_p9 = pnand %p81_p8, %p75_p5 }
  0x1d   :  { %v51_v4 = vpop.eup %50 }
  0x1e   :  { %v53_v5 = vpop.eup %52  ;;  %v27_v6 = vadd.f32 1.0, %v51_v4 }
  0x1f   :  { %v28_v7 = vadd.f32 1.0, %v53_v5 }
  0x20   :  { %v29_v8 = vmul.f32 %v27_v6, %v23_v2 }
  0x21   :  { %v30_v9 = vmul.f32 %v28_v7, %v24_v3 }
  0x22   :  { %31 = vst [vmem:[#allocation5] sm:$0xff] %v29_v8 }
  0x23   :  { %32 = vst [vmem:[#allocation5 + $0x8] sm:$0xff] %v30_v9 }
  0x24   :  { %85 = shalt.err (!%p82_p9)
}
  0x25   :  { %42 = dma.vmem_to_hbm [thread:$0]  %s40_s12, 256, %s117_s1, [#allocation4]  }
  0x26   :  { %96 = dma.done.wait [#allocation4], 256  }
  0x27   :  { %97 = vsyncadd [#allocation4], 4294967040 }
  0x28   :  { %46 = vsyncpa [#allocation3], 1 }
  0x29   :  { %47 = vsyncpa [#allocation4], 1 }

</bundles_post_ra>
